<compile_context>
chip_gen: v7x
topology: tpu7x:2x2x1
jax: 0.10.0
libtpu: 0.0.40
codegen_flags: <defaults>
</compile_context>

<pallas_src>
import functools

import jax
import jax.numpy as jnp
from jax import lax
from jax.experimental import pallas as pl
from jax.experimental.pallas import tpu as pltpu

EPS = 1e-5  # nn.BatchNorm2d default eps


def _stats_kernel(x_ref, w_ref, sum_ref, sumsq_ref):
    """Pass 1: per-column sum and sum-of-squares of Y = X @ Wmat (no bias)."""
    @pl.when(pl.program_id(0) == 0)
    def _():
        sum_ref[...] = jnp.zeros_like(sum_ref)
        sumsq_ref[...] = jnp.zeros_like(sumsq_ref)

    y = jnp.dot(x_ref[...], w_ref[...], preferred_element_type=jnp.float32)
    sum_ref[...] += jnp.sum(y, axis=0, keepdims=True)        # (1, KKC)
    sumsq_ref[...] += jnp.sum(y * y, axis=0, keepdims=True)  # (1, KKC)


def _apply_kernel(x_ref, w_ref, scale_ref, shift_ref, o_ref):
    """Pass 2: recompute Y block and apply fused BN affine: Y*scale + shift."""
    y = jnp.dot(x_ref[...], w_ref[...], preferred_element_type=jnp.float32)
    o_ref[...] = (y * scale_ref[...] + shift_ref[...]).astype(o_ref.dtype)


def _round_up(x, m):
    return (x + m - 1) // m * m


@functools.partial(
    jax.jit, static_argnames=("k_size", "stride", "padding", "block_rows"))
def deconv2d_batchnorm(x_nchw, w_iohw, bias, gamma, beta, *,
                       k_size, stride, padding, block_rows=256):
    """ConvTranspose2d(k, s, p, bias=True) + BatchNorm2d (training-mode stats).

    x_nchw : (N, Cin, H, W)          (PyTorch NCHW)
    w_iohw : (Cin, Cout, k, k)       (PyTorch ConvTranspose2d weight layout)
    returns: (N, Cout, H*stride, W*stride) in NCHW.
    """
    assert k_size == stride and padding == 0, (
        "Pallas kernel is specialized to kernel_size == stride, padding == 0")
    N, Cin, H, W = x_nchw.shape
    cin_w, Cout, kH, kW = w_iohw.shape
    assert (cin_w, kH, kW) == (Cin, k_size, k_size)
    k = k_size
    R, KKC = N * H * W, k * k * Cout

    TR = block_rows
    Cin_p = _round_up(Cin, 128)   # lane-dense contraction dim
    KKC_p = _round_up(KKC, 128)   # lane-dense output dim (unmasked vst)
    R_p = _round_up(R, TR)        # zero rows contribute nothing to the stats
    n_blocks = R_p // TR

    # ---- wrapper-side layout plumbing (no compute; fused under jit) ----
    x_flat = jnp.transpose(x_nchw, (0, 2, 3, 1)).reshape(R, Cin)
    x_flat = jnp.pad(x_flat, ((0, R_p - R), (0, Cin_p - Cin))).astype(jnp.bfloat16)
    # Wmat[ci, (kh*k + kw)*Cout + co] = W[ci, co, kh, kw]
    w_mat = jnp.transpose(w_iohw, (0, 2, 3, 1)).reshape(Cin, KKC)
    w_mat = jnp.pad(w_mat, ((0, Cin_p - Cin), (0, KKC_p - KKC))).astype(jnp.bfloat16)

    x_spec = pl.BlockSpec((TR, Cin_p), lambda i: (i, 0))
    w_spec = pl.BlockSpec((Cin_p, KKC_p), lambda i: (0, 0))
    vec_spec = pl.BlockSpec((1, KKC_p), lambda i: (0, 0))

    # ---- pass 1: column sum / sumsq, accumulated across the row grid -------
    col_sum, col_sumsq = pl.pallas_call(
        _stats_kernel,
        out_shape=(jax.ShapeDtypeStruct((1, KKC_p), jnp.float32),
                   jax.ShapeDtypeStruct((1, KKC_p), jnp.float32)),
        grid=(n_blocks,),
        in_specs=[x_spec, w_spec],
        out_specs=(vec_spec, vec_spec),
        compiler_params=pltpu.CompilerParams(
            dimension_semantics=("arbitrary",),   # reduction into resident out
            vmem_limit_bytes=32 << 20),
    )(x_flat, w_mat)

    # ---- finalize BN stats on tiny (Cout,)-sized vectors (pure JAX) --------
    # Pool the k*k tap-columns of each output channel: (1,KKC) -> (k*k,Cout).
    cnt = jnp.float32(R * k * k)
    ch_sum = col_sum[0, :KKC].reshape(k * k, Cout).sum(axis=0)
    ch_sumsq = col_sumsq[0, :KKC].reshape(k * k, Cout).sum(axis=0)
    mean_raw = ch_sum / cnt
    # TODO(synk): one-pass E[x^2]-E[x]^2 can cancel for |mean| >> std; use a
    # mean-shifted (Welford-style) accumulation at production scale.
    var = ch_sumsq / cnt - mean_raw * mean_raw            # biased (training)
    bias_f = bias.astype(jnp.float32)
    mean = mean_raw + bias_f                              # conv bias -> mean shift
    scale = gamma.astype(jnp.float32) * lax.rsqrt(var + EPS)
    shift = beta.astype(jnp.float32) + (bias_f - mean) * scale
    scale_t = jnp.pad(jnp.tile(scale, k * k), (0, KKC_p - KKC)).reshape(1, KKC_p)
    shift_t = jnp.pad(jnp.tile(shift, k * k), (0, KKC_p - KKC)).reshape(1, KKC_p)

    # ---- pass 2: recompute matmul + fused normalize, row-parallel ----------
    y = pl.pallas_call(
        _apply_kernel,
        out_shape=jax.ShapeDtypeStruct((R_p, KKC_p), jnp.float32),
        grid=(n_blocks,),
        in_specs=[x_spec, w_spec, vec_spec, vec_spec],
        out_specs=pl.BlockSpec((TR, KKC_p), lambda i: (i, 0)),
        compiler_params=pltpu.CompilerParams(
            dimension_semantics=("parallel",),    # independent blocks (v7x 2xTC)
            vmem_limit_bytes=32 << 20),
    )(x_flat, w_mat, scale_t, shift_t)

    # depth-to-space: (R, k*k*Cout) -> (N, H*k, W*k, Cout) -> NCHW
    y = y[:R, :KKC].reshape(N, H, W, k, k, Cout)
    y = jnp.transpose(y, (0, 1, 3, 2, 4, 5)).reshape(N, H * k, W * k, Cout)
    return jnp.transpose(y, (0, 3, 1, 2))


def deconv2d_batchnorm_ref(x_nchw, w_iohw, bias, gamma, beta, *,
                           k_size, stride, padding):
    """Pure-JAX reference mirroring the PyTorch forward (training-mode BN),
    with the kernel's mixed precision (bf16 matmul operands, f32 accumulate)."""
    cin, cout, kH, kW = w_iohw.shape
    x = jnp.transpose(x_nchw, (0, 2, 3, 1)).astype(jnp.bfloat16).astype(jnp.float32)
    w_hwio = jnp.transpose(w_iohw[:, :, ::-1, ::-1], (2, 3, 0, 1))   # (kH,kW,Cin,Cout)
    w_hwio = w_hwio.astype(jnp.bfloat16).astype(jnp.float32)
    y = lax.conv_general_dilated(
        x, w_hwio, window_strides=(1, 1),
        padding=((kH - 1 - padding, kH - 1 - padding),
                 (kW - 1 - padding, kW - 1 - padding)),
        lhs_dilation=(stride, stride),
        dimension_numbers=("NHWC", "HWIO", "NHWC"),
        precision=lax.Precision.HIGHEST)
    y = y + bias
    mean = y.mean(axis=(0, 1, 2))
    var = ((y - mean) ** 2).mean(axis=(0, 1, 2))                     # biased (training)
    y = (y - mean) * lax.rsqrt(var + EPS) * gamma + beta
    return jnp.transpose(y, (0, 3, 1, 2))                            # NCHW


if __name__ == "__main__":
    # deconv2DBatchNorm(in_channels=128, n_filters=32, k_size=2, stride=2,
    #                   padding=0, bias=True) -- a 2x learned-upsampling deconv.
    N, Cin, H, W = 2, 128, 16, 16
    Cout, K, S, P = 32, 2, 2, 0

    key = jax.random.PRNGKey(0)
    kx, kw, kb, kg, kbt = jax.random.split(key, 5)
    x = jax.random.normal(kx, (N, Cin, H, W), jnp.float32)            # PyTorch NCHW
    w = jax.random.normal(kw, (Cin, Cout, K, K), jnp.float32) * (2.0 / Cin) ** 0.5
    b = 0.1 * jax.random.normal(kb, (Cout,), jnp.float32)
    gamma = 1.0 + 0.1 * jax.random.normal(kg, (Cout,), jnp.float32)
    beta = 0.1 * jax.random.normal(kbt, (Cout,), jnp.float32)

    out = deconv2d_batchnorm(x, w, b, gamma, beta, k_size=K, stride=S, padding=P)
    out = jax.block_until_ready(out)

    ref = deconv2d_batchnorm_ref(x, w, b, gamma, beta, k_size=K, stride=S, padding=P)
    assert out.shape == (N, Cout, H * S, W * S), out.shape
    max_err = jnp.max(jnp.abs(out - ref))
    # bf16 MXU operands -> compare against the matching mixed-precision ref.
    assert jnp.allclose(out, ref, atol=2e-3, rtol=2e-3), f"max abs err = {max_err}"

    print("KERNEL_OK")
</pallas_src>

<mosaic_0001>
module attributes {stable_mosaic.version = 11 : i64} {
  func.func @_stats_kernel(%arg0: i32, %arg1: memref<256x128xbf16, #tpu.memory_space<vmem>>, %arg2: memref<128x128xbf16, #tpu.memory_space<vmem>>, %arg3: memref<1x128xf32, #tpu.memory_space<vmem>>, %arg4: memref<1x128xf32, #tpu.memory_space<vmem>>) attributes {dimension_semantics = [#tpu.dimension_semantics<arbitrary>], iteration_bounds = array<i64: 2>, scalar_prefetch = 0 : i64, scratch_operands = 0 : i64, tpu.core_type = #tpu.core_type<tc>, window_params = [{transform_indices = @transform_0, window_bounds = array<i64: 256, 128>}, {pipeline_mode = #tpu.pipeline_mode<synchronous>, transform_indices = @transform_1, window_bounds = array<i64: 128, 128>}, {pipeline_mode = #tpu.pipeline_mode<synchronous>, transform_indices = @transform_2, window_bounds = array<i64: 1, 128>}, {pipeline_mode = #tpu.pipeline_mode<synchronous>, transform_indices = @transform_3, window_bounds = array<i64: 1, 128>}]} {
    %c0_i32 = arith.constant 0 : i32
    %0 = arith.cmpi eq, %arg0, %c0_i32 : i32
    %1 = arith.extui %0 : i1 to i32
    %c0_i32_0 = arith.constant 0 : i32
    %2 = arith.cmpi ne, %1, %c0_i32_0 : i32
    scf.if %2 {
      %cst_14 = arith.constant 0.000000e+00 : f32
      %17 = vector.broadcast %cst_14 : f32 to vector<1x128xf32>
      %c0_15 = arith.constant 0 : index
      %c0_16 = arith.constant 0 : index
      %18 = vector.load %arg3[%c0_15, %c0_16] : memref<1x128xf32, #tpu.memory_space<vmem>>, vector<1x128xf32>
      tpu.vector_store %arg3[%c0_15, %c0_16], %17 {strides = array<i32>} : memref<1x128xf32, #tpu.memory_space<vmem>>, vector<1x128xf32>,
      %cst_17 = arith.constant 0.000000e+00 : f32
      %19 = vector.broadcast %cst_17 : f32 to vector<1x128xf32>
      %c0_18 = arith.constant 0 : index
      %c0_19 = arith.constant 0 : index
      %20 = vector.load %arg4[%c0_18, %c0_19] : memref<1x128xf32, #tpu.memory_space<vmem>>, vector<1x128xf32>
      tpu.vector_store %arg4[%c0_18, %c0_19], %19 {strides = array<i32>} : memref<1x128xf32, #tpu.memory_space<vmem>>, vector<1x128xf32>,
    } else {
    }
    %c0 = arith.constant 0 : index
    %c0_1 = arith.constant 0 : index
    %3 = vector.load %arg1[%c0, %c0_1] : memref<256x128xbf16, #tpu.memory_space<vmem>>, vector<256x128xbf16>
    %c0_2 = arith.constant 0 : index
    %c0_3 = arith.constant 0 : index
    %4 = vector.load %arg2[%c0_2, %c0_3] : memref<128x128xbf16, #tpu.memory_space<vmem>>, vector<128x128xbf16>
    %cst = arith.constant dense<0.000000e+00> : vector<256x128xf32>
    %5 = tpu.matmul %3, %4, %cst {dimension_numbers = #tpu.dot_dimension_numbers<[1], [0], [0], [1], [0, 0, 1, 1], [], []>} : vector<256x128xbf16>, vector<128x128xbf16>, vector<256x128xf32> -> vector<256x128xf32>
    %c0_4 = arith.constant 0 : index
    %c0_5 = arith.constant 0 : index
    %6 = vector.load %arg3[%c0_4, %c0_5] : memref<1x128xf32, #tpu.memory_space<vmem>>, vector<1x128xf32>
    %cst_6 = arith.constant dense<0.000000e+00> : vector<128xf32>
    %7 = vector.multi_reduction <add>, %5, %cst_6 [0] : vector<256x128xf32> to vector<128xf32>
    %8 = vector.shape_cast %7 : vector<128xf32> to vector<1x128xf32>
    %9 = arith.addf %6, %8 : vector<1x128xf32>
    %c0_7 = arith.constant 0 : index
    %c0_8 = arith.constant 0 : index
    %10 = vector.load %arg3[%c0_7, %c0_8] : memref<1x128xf32, #tpu.memory_space<vmem>>, vector<1x128xf32>
    tpu.vector_store %arg3[%c0_7, %c0_8], %9 {strides = array<i32>} : memref<1x128xf32, #tpu.memory_space<vmem>>, vector<1x128xf32>,
    %c0_9 = arith.constant 0 : index
    %c0_10 = arith.constant 0 : index
    %11 = vector.load %arg4[%c0_9, %c0_10] : memref<1x128xf32, #tpu.memory_space<vmem>>, vector<1x128xf32>
    %12 = arith.mulf %5, %5 : vector<256x128xf32>
    %cst_11 = arith.constant dense<0.000000e+00> : vector<128xf32>
    %13 = vector.multi_reduction <add>, %12, %cst_11 [0] : vector<256x128xf32> to vector<128xf32>
    %14 = vector.shape_cast %13 : vector<128xf32> to vector<1x128xf32>
    %15 = arith.addf %11, %14 : vector<1x128xf32>
    %c0_12 = arith.constant 0 : index
    %c0_13 = arith.constant 0 : index
    %16 = vector.load %arg4[%c0_12, %c0_13] : memref<1x128xf32, #tpu.memory_space<vmem>>, vector<1x128xf32>
    tpu.vector_store %arg4[%c0_12, %c0_13], %15 {strides = array<i32>} : memref<1x128xf32, #tpu.memory_space<vmem>>, vector<1x128xf32>,
    return
  }
  func.func @transform_0(%arg0: i32) -> (i32, i32) {
    %c0_i32 = arith.constant 0 : i32
    %c0_i32_0 = arith.constant 0 : i32
    return %arg0, %c0_i32 : i32, i32
  }
  func.func @transform_1(%arg0: i32) -> (i32, i32) {
    %c0_i32 = arith.constant 0 : i32
    %c0_i32_0 = arith.constant 0 : i32
    %c0_i32_1 = arith.constant 0 : i32
    return %c0_i32, %c0_i32_0 : i32, i32
  }
  func.func @transform_2(%arg0: i32) -> (i32, i32) {
    %c0_i32 = arith.constant 0 : i32
    %c0_i32_0 = arith.constant 0 : i32
    %c0_i32_1 = arith.constant 0 : i32
    return %c0_i32, %c0_i32_0 : i32, i32
  }
  func.func @transform_3(%arg0: i32) -> (i32, i32) {
    %c0_i32 = arith.constant 0 : i32
    %c0_i32_0 = arith.constant 0 : i32
    %c0_i32_1 = arith.constant 0 : i32
    return %c0_i32, %c0_i32_0 : i32, i32
  }
}

module attributes {stable_mosaic.version = 11 : i64} {
  func.func @_apply_kernel(%arg0: i32, %arg1: memref<256x128xbf16, #tpu.memory_space<vmem>>, %arg2: memref<128x128xbf16, #tpu.memory_space<vmem>>, %arg3: memref<1x128xf32, #tpu.memory_space<vmem>>, %arg4: memref<1x128xf32, #tpu.memory_space<vmem>>, %arg5: memref<256x128xf32, #tpu.memory_space<vmem>>) attributes {dimension_semantics = [#tpu.dimension_semantics<parallel>], iteration_bounds = array<i64: 2>, scalar_prefetch = 0 : i64, scratch_operands = 0 : i64, tpu.core_type = #tpu.core_type<tc>, window_params = [{transform_indices = @transform_0, window_bounds = array<i64: 256, 128>}, {pipeline_mode = #tpu.pipeline_mode<synchronous>, transform_indices = @transform_1, window_bounds = array<i64: 128, 128>}, {pipeline_mode = #tpu.pipeline_mode<synchronous>, transform_indices = @transform_2, window_bounds = array<i64: 1, 128>}, {pipeline_mode = #tpu.pipeline_mode<synchronous>, transform_indices = @transform_3, window_bounds = array<i64: 1, 128>}, {transform_indices = @transform_4, window_bounds = array<i64: 256, 128>}]} {
    %c0 = arith.constant 0 : index
    %c0_0 = arith.constant 0 : index
    %0 = vector.load %arg1[%c0, %c0_0] : memref<256x128xbf16, #tpu.memory_space<vmem>>, vector<256x128xbf16>
    %c0_1 = arith.constant 0 : index
    %c0_2 = arith.constant 0 : index
    %1 = vector.load %arg2[%c0_1, %c0_2] : memref<128x128xbf16, #tpu.memory_space<vmem>>, vector<128x128xbf16>
    %cst = arith.constant dense<0.000000e+00> : vector<256x128xf32>
    %2 = tpu.matmul %0, %1, %cst {dimension_numbers = #tpu.dot_dimension_numbers<[1], [0], [0], [1], [0, 0, 1, 1], [], []>} : vector<256x128xbf16>, vector<128x128xbf16>, vector<256x128xf32> -> vector<256x128xf32>
    %c0_3 = arith.constant 0 : index
    %c0_4 = arith.constant 0 : index
    %3 = vector.load %arg3[%c0_3, %c0_4] : memref<1x128xf32, #tpu.memory_space<vmem>>, vector<1x128xf32>
    %4 = vector.broadcast %3 : vector<1x128xf32> to vector<256x128xf32>
    %5 = arith.mulf %2, %4 : vector<256x128xf32>
    %c0_5 = arith.constant 0 : index
    %c0_6 = arith.constant 0 : index
    %6 = vector.load %arg4[%c0_5, %c0_6] : memref<1x128xf32, #tpu.memory_space<vmem>>, vector<1x128xf32>
    %7 = vector.broadcast %6 : vector<1x128xf32> to vector<256x128xf32>
    %8 = arith.addf %5, %7 : vector<256x128xf32>
    %c0_7 = arith.constant 0 : index
    %c0_8 = arith.constant 0 : index
    %9 = vector.load %arg5[%c0_7, %c0_8] : memref<256x128xf32, #tpu.memory_space<vmem>>, vector<256x128xf32>
    tpu.vector_store %arg5[%c0_7, %c0_8], %8 {strides = array<i32>} : memref<256x128xf32, #tpu.memory_space<vmem>>, vector<256x128xf32>,
    return
  }
  func.func @transform_0(%arg0: i32) -> (i32, i32) {
    %c0_i32 = arith.constant 0 : i32
    %c0_i32_0 = arith.constant 0 : i32
    return %arg0, %c0_i32 : i32, i32
  }
  func.func @transform_1(%arg0: i32) -> (i32, i32) {
    %c0_i32 = arith.constant 0 : i32
    %c0_i32_0 = arith.constant 0 : i32
    %c0_i32_1 = arith.constant 0 : i32
    return %c0_i32, %c0_i32_0 : i32, i32
  }
  func.func @transform_2(%arg0: i32) -> (i32, i32) {
    %c0_i32 = arith.constant 0 : i32
    %c0_i32_0 = arith.constant 0 : i32
    %c0_i32_1 = arith.constant 0 : i32
    return %c0_i32, %c0_i32_0 : i32, i32
  }
  func.func @transform_3(%arg0: i32) -> (i32, i32) {
    %c0_i32 = arith.constant 0 : i32
    %c0_i32_0 = arith.constant 0 : i32
    %c0_i32_1 = arith.constant 0 : i32
    return %c0_i32, %c0_i32_0 : i32, i32
  }
  func.func @transform_4(%arg0: i32) -> (i32, i32) {
    %c0_i32 = arith.constant 0 : i32
    %c0_i32_0 = arith.constant 0 : i32
    return %arg0, %c0_i32 : i32, i32
  }
}

</mosaic_0001>

<bundles_post_ra>
// kernel: squeeze.2
= control target key start
LH: loop header
LB: loop body
LE: loop exit
PB: predicated region body
PF: predicated region fallthrough
CT: control target
= control target key end

     0   :  { %s37_s8 = smov 32   ;;  %vm7_vm0 = vcmask 261120   ;;  %s38_s9 = smov 64   ;;  %s55_s0 = inlined_call_operand.vmem [shape: f32[128], index: 0, kind: input, shape index: {}]   ;;  %s56_s1 = inlined_call_operand.vmem [shape: f32[4,32], index: 1, kind: output, shape index: {}]  }
   0x1   :  { %v4_v0 = vld [vmem:[%s55_s0] sm:$0x1]  ;;  %s36_s0 = smov 96  }
   0x2   :  { %5 = vst [vmem:[#allocation1] sm:$0x1] %v4_v0 }
   0x9   :  { %v9_v1 = vld [vmem:[#allocation1] sm:$0x1]  }
   0xa   :  { %v21_v2 = vld [vmem:[#allocation1] sm:$0x1]   ;;  %10 = vrot.lane.b32.xlu0 %v9_v1, %s36_s0 }
   0xb   :  { %22 = vrot.lane.b32.xlu1 %v21_v2, %s37_s8  ;;  %v6_v3 = vld [vmem:[#allocation1] sm:$0x1]  }
   0xc   :  { %v15_v4 = vld [vmem:[#allocation1] sm:$0x1]   ;;  %8 = vst.msk [vmem:[#allocation0] sm:$0x1] %vm7_vm0, %v6_v3  }
   0xe   :  { %16 = vrot.lane.b32.xlu0 %v15_v4, %s38_s9 }
  0x7c   :  { %v11_v5 = vpop.permute.xlu0 %10  }
  0x7d   :  { %v23_v6 = vpop.permute.xlu1 %22   ;;  %14 = vst.msk [vmem:[#allocation0 + $0x1] sm:$0x1] %vm7_vm0, %v11_v5  }
  0x7e   :  { %26 = vst.msk [vmem:[#allocation0 + $0x3] sm:$0x1] %vm7_vm0, %v23_v6  }
  0x80   :  { %v17_v7 = vpop.permute.xlu0 %16  }
  0x81   :  { %20 = vst.msk [vmem:[#allocation0 + $0x2] sm:$0x1] %vm7_vm0, %v17_v7  }
  0x88   :  { %v30_v8 = vld [vmem:[#allocation0] sm:$0xf] }
  0x89   :  { %32 = vst [vmem:[%s56_s1] sm:$0xf] %v30_v8 }

// kernel: tile.18
= control target key start
LH: loop header
LB: loop body
LE: loop exit
PB: predicated region body
PF: predicated region fallthrough
CT: control target
= control target key end

     0   :  { %s22_s0 = inlined_call_operand.vmem [shape: f32[32], index: 0, kind: input, shape index: {}]   ;;  %s23_s1 = inlined_call_operand.vmem [shape: f32[4,32], index: 1, kind: output, shape index: {}]  }
   0x1   :  { %v4_v0 = vld [vmem:[%s22_s0] ss:$0 sm:$0xff] }
   0x2   :  { %5 = vst [vmem:[%s23_s1] sm:$0xf] %v4_v0 }

// kernel: deconv2d_batchnorm.2
= control target key start
LH: loop header
LB: loop body
LE: loop exit
PB: predicated region body
PF: predicated region fallthrough
CT: control target
= control target key end

     0   :  { %s845_s12 = smov 0   ;;  %s969_s0 = inlined_call_operand.vmem [shape: bf16[512,128], index: 0, kind: input, shape index: {}]   ;;  %s970_s1 = inlined_call_operand.vmem [shape: bf16[128,128], index: 1, kind: input, shape index: {}]   ;;  %s971_s2 = inlined_call_operand.vmem [shape: f32[1,128], index: 2, kind: output, shape index: {0}]   ;;  %s972_s3 = inlined_call_operand.vmem [shape: f32[1,128], index: 3, kind: output, shape index: {1}]  }
   0x1 LB: > { %s662_s13 = sadd.s32 4294967295, %s822_s12   ;;  %p665_p0 = scmp.ge.s32.totalorder %s822_s12, 1  ;;  %s822_s12 = sphi %s845_s12, %s14_s12  }
   0x2   : > { %p131_p1 = scmp.lt.s32.totalorder %s822_s12, 3 }
   0x4   : > { %p132_p2 = pnand %p665_p0, %p131_p1 }
   0x5   : > { %s666_s14 = sshll.u32 (!%p132_p2), %s662_s13, 5  ;;  %p668_p4 = scmp.ne.s32.totalorder (!%p132_p2), %s662_s13, 0 }
   0x6   : > { %135 = sbr.rel (%p132_p2) target bundleno = 347 (0x15b), region = 28  ;;  %p151_p3 = scmp.lt.s32.totalorder (!%p132_p2), %s666_s14, 63 }
   0xd   : > { %s974_s14 = smov (!%p151_p3, %s666_s14), 63  ;;  %160 = sbr.rel (%p668_p4) target bundleno = 20 (0x14), region = 32 }
   0xe   : > { %s667_s15 = sshll.u32 %s974_s14, 2  ;;  %v824_v0 = vmov (!%p668_p4), 0.0  }
   0xf   : > { %s856_s18 = scalar_lea.vmem %s969_s0, %s667_s15  ;;  %161 = vst [vmem:[%s971_s2] sm:$0x1] (!%p668_p4), %v824_v0  ;;  %162 = vst [vmem:[%s972_s3] sm:$0x1] (!%p668_p4), %v824_v0 }
  0x14 PF: > { %v792_v1 = vld [vmem:[%s970_s1] sm:$0xff]   ;;  %v793_v2 = vld [vmem:[%s970_s1 + $0x8] sm:$0xff]   ;;  %v794_v3 = vld [vmem:[%s970_s1 + $0x10] sm:$0xff]  }
  0x15   : > { %719 = vmatprep.subr.bf16.mxu0 %v792_v1  ;;  %767 = vmatprep.subr.bf16.mxu1 %v792_v1  ;;  %v795_v4 = vld [vmem:[%s970_s1 + $0x18] sm:$0xff]   ;;  %v800_v5 = vld [vmem:[%s856_s18] sm:$0xff]   ;;  %v797_v7 = vld [vmem:[%s970_s1 + $0x28] sm:$0xff]  }
  0x16   : > { %720 = vmatpush3.bf16.msra.mxu0 %v792_v1  ;;  %775 = vmatpush3.bf16.msra.mxu1 %v792_v1  ;;  %v796_v6 = vld [vmem:[%s970_s1 + $0x20] sm:$0xff]   ;;  %v798_v9 = vld [vmem:[%s970_s1 + $0x30] sm:$0xff]   ;;  %v799_v10 = vld [vmem:[%s970_s1 + $0x38] sm:$0xff]  }
  0x17   : > { %721 = vmatprep.subr.bf16.mxu0 %v793_v2  ;;  %768 = vmatprep.subr.bf16.mxu1 %v793_v2  ;;  %v808_v8 = vld [vmem:[%s856_s18 + $0x40] sm:$0xff]   ;;  %v801_v11 = vld [vmem:[%s856_s18 + $0x8] sm:$0xff]   ;;  %v802_v13 = vld [vmem:[%s856_s18 + $0x10] sm:$0xff]  }
  0x18   : > { %735 = vmatprep.mubr.bf16.mxu0 %v800_v5  ;;  %751 = vmatprep.mubr.bf16.mxu1 %v808_v8  ;;  %v809_v12 = vld [vmem:[%s856_s18 + $0x48] sm:$0xff]   ;;  %v810_v14 = vld [vmem:[%s856_s18 + $0x50] sm:$0xff]   ;;  %v803_v15 = vld [vmem:[%s856_s18 + $0x18] sm:$0xff]  }
  0x19   : > { %v811_v16 = vld [vmem:[%s856_s18 + $0x58] sm:$0xff]   ;;  %v804_v17 = vld [vmem:[%s856_s18 + $0x20] sm:$0xff]   ;;  %v805_v19 = vld [vmem:[%s856_s18 + $0x28] sm:$0xff]  }
  0x1a   : > { %722 = vmatpush3.bf16.msra.mxu0 %v793_v2  ;;  %776 = vmatpush3.bf16.msra.mxu1 %v793_v2  ;;  %v812_v18 = vld [vmem:[%s856_s18 + $0x60] sm:$0xff]   ;;  %v813_v20 = vld [vmem:[%s856_s18 + $0x68] sm:$0xff]   ;;  %v806_v21 = vld [vmem:[%s856_s18 + $0x30] sm:$0xff]  }
  0x1b   : > { %723 = vmatprep.subr.bf16.mxu0 %v794_v3  ;;  %769 = vmatprep.subr.bf16.mxu1 %v794_v3  ;;  %v814_v22 = vld [vmem:[%s856_s18 + $0x70] sm:$0xff]   ;;  %v807_v23 = vld [vmem:[%s856_s18 + $0x38] sm:$0xff]  }
  0x1c   : > { %v815_v24 = vld [vmem:[%s856_s18 + $0x78] sm:$0xff]  }
  0x1e   : > { %724 = vmatpush3.bf16.msra.mxu0 %v794_v3  ;;  %777 = vmatpush3.bf16.msra.mxu1 %v794_v3 }
  0x1f   : > { %725 = vmatprep.subr.bf16.mxu0 %v795_v4  ;;  %770 = vmatprep.subr.bf16.mxu1 %v795_v4 }
  0x22   : > { %726 = vmatpush3.bf16.msra.mxu0 %v795_v4  ;;  %778 = vmatpush3.bf16.msra.mxu1 %v795_v4 }
  0x23   : > { %727 = vmatprep.subr.bf16.mxu0 %v796_v6  ;;  %771 = vmatprep.subr.bf16.mxu1 %v796_v6 }
  0x26   : > { %728 = vmatpush3.bf16.msra.mxu0 %v796_v6  ;;  %779 = vmatpush3.bf16.msra.mxu1 %v796_v6 }
  0x27   : > { %729 = vmatprep.subr.bf16.mxu0 %v797_v7  ;;  %772 = vmatprep.subr.bf16.mxu1 %v797_v7 }
  0x2a   : > { %730 = vmatpush3.bf16.msra.mxu0 %v797_v7  ;;  %780 = vmatpush3.bf16.msra.mxu1 %v797_v7 }
  0x2b   : > { %731 = vmatprep.subr.bf16.mxu0 %v798_v9  ;;  %773 = vmatprep.subr.bf16.mxu1 %v798_v9 }
  0x2e   : > { %732 = vmatpush3.bf16.msra.mxu0 %v798_v9  ;;  %781 = vmatpush3.bf16.msra.mxu1 %v798_v9 }
  0x2f   : > { %733 = vmatprep.subr.bf16.mxu0 %v799_v10  ;;  %774 = vmatprep.subr.bf16.mxu1 %v799_v10 }
  0x32   : > { %734 = vmatpush3.bf16.msra.mxu0 %v799_v10  ;;  %782 = vmatpush3.bf16.msra.mxu1 %v799_v10 }
  0x35   : > { %736 = vmatmul.mubr.bf16.vlgmr.msra.gmra.mrb[0].mxu0 %v801_v11  ;;  %752 = vmatmul.mubr.bf16.vlgmr.msra.gmra.mrb[0].mxu1 %v809_v12 }
  0x36   : > { %739 = vmatprep.mubr.bf16.mxu0 %v802_v13  ;;  %755 = vmatprep.mubr.bf16.mxu1 %v810_v14 }
  0x3d   : > { %740 = vmatmul.mubr.bf16.gmra.mrb[4].mxu0 %v803_v15  ;;  %756 = vmatmul.mubr.bf16.gmra.mrb[4].mxu1 %v811_v16 }
  0x3e   : > { %743 = vmatprep.mubr.bf16.mxu0 %v804_v17  ;;  %759 = vmatprep.mubr.bf16.mxu1 %v812_v18 }
  0x45   : > { %744 = vmatmul.mubr.bf16.gmra.mrb[8].mxu0 %v805_v19  ;;  %760 = vmatmul.mubr.bf16.gmra.mrb[8].mxu1 %v813_v20 }
  0x46   : > { %747 = vmatprep.mubr.bf16.mxu0 %v806_v21  ;;  %763 = vmatprep.mubr.bf16.mxu1 %v814_v22 }
  0x4d   : > { %748 = vmatmul.mubr.bf16.gmra.mrb[12].mxu0 %v807_v23  ;;  %764 = vmatmul.mubr.bf16.gmra.mrb[12].mxu1 %v815_v24 }
 0x108   : > { %v737_v25 = vpop.f32.mrb[0].mxu0  ;;  %v904_v26 = vpop.f32.mrb[0].mxu1 }
 0x109   : > { %v389_v27 = vpop.f32.mrb[1].mxu0  ;;  %v906_v28 = vpop.f32.mrb[1].mxu1  ;;  %v559_v36 = vmul.f32 %v737_v25, %v737_v25 }
 0x10a   : > { %v738_v29 = vpop.f32.mrb[2].mxu0  ;;  %v908_v30 = vpop.f32.mrb[2].mxu1  ;;  %v557_v33 = vmul.f32 %v389_v27, %v389_v27 }
 0x10b   : > { %v392_v31 = vpop.f32.mrb[3].mxu0  ;;  %v910_v32 = vpop.f32.mrb[3].mxu1  ;;  %v560_v39 = vmul.f32 %v738_v29, %v738_v29 }
 0x10c   : > { %v517_v34 = vadd.f32 %v392_v31, %v389_v27  ;;  %v558_v35 = vmul.f32 %v392_v31, %v392_v31 }
 0x10e   : > { %v518_v37 = vadd.f32 %v737_v25, %v517_v34  ;;  %v589_v38 = vadd.f32 %v558_v35, %v557_v33 }
 0x110   : > { %v590_v40 = vadd.f32 %v589_v38, %v559_v36  ;;  %v741_v41 = vpop.f32.mrb[4].mxu0  ;;  %v519_v42 = vadd.f32 %v738_v29, %v518_v37  ;;  %v912_v43 = vpop.f32.mrb[4].mxu1 }
 0x111   : > { %v405_v44 = vpop.f32.mrb[5].mxu0  ;;  %v914_v45 = vpop.f32.mrb[5].mxu1  ;;  %v563_v56 = vmul.f32 %v741_v41, %v741_v41 }
 0x112   : > { %v520_v46 = vadd.f32 %v519_v42, %v405_v44  ;;  %v561_v47 = vmul.f32 %v405_v44, %v405_v44  ;;  %v591_v48 = vadd.f32 %v590_v40, %v560_v39  ;;  %v742_v49 = vpop.f32.mrb[6].mxu0  ;;  %v916_v50 = vpop.f32.mrb[6].mxu1  ;;  %v573_v42 = vmul.f32 %v906_v28, %v906_v28 }
 0x113   : > { %v408_v51 = vpop.f32.mrb[7].mxu0  ;;  %v918_v52 = vpop.f32.mrb[7].mxu1  ;;  %v564_v59 = vmul.f32 %v742_v49, %v742_v49 }
 0x114   : > { %v592_v53 = vadd.f32 %v591_v48, %v561_v47  ;;  %v521_v54 = vadd.f32 %v520_v46, %v408_v51  ;;  %v562_v55 = vmul.f32 %v408_v51, %v408_v51  ;;  %v575_v51 = vmul.f32 %v904_v26, %v904_v26 }
 0x116   : > { %v522_v57 = vadd.f32 %v741_v41, %v521_v54  ;;  %v593_v58 = vadd.f32 %v592_v53, %v562_v55  ;;  %v576_v55 = vmul.f32 %v908_v30, %v908_v30 }
 0x118   : > { %v594_v60 = vadd.f32 %v593_v58, %v563_v56  ;;  %v745_v61 = vpop.f32.mrb[8].mxu0  ;;  %v523_v62 = vadd.f32 %v742_v49, %v522_v57  ;;  %v920_v63 = vpop.f32.mrb[8].mxu1  ;;  %v574_v49 = vmul.f32 %v910_v32, %v910_v32 }
 0x119   : > { %v421_v0 = vpop.f32.mrb[9].mxu0  ;;  %v485_v1 = vpop.f32.mrb[9].mxu1  ;;  %v567_v12 = vmul.f32 %v745_v61, %v745_v61 }
 0x11a   : > { %v524_v2 = vadd.f32 %v523_v62, %v421_v0  ;;  %v565_v3 = vmul.f32 %v421_v0, %v421_v0  ;;  %v595_v4 = vadd.f32 %v594_v60, %v564_v59  ;;  %v746_v5 = vpop.f32.mrb[10].mxu0  ;;  %v922_v6 = vpop.f32.mrb[10].mxu1 }
 0x11b   : > { %v424_v7 = vpop.f32.mrb[11].mxu0  ;;  %v488_v8 = vpop.f32.mrb[11].mxu1  ;;  %v568_v15 = vmul.f32 %v746_v5, %v746_v5 }
 0x11c   : > { %v596_v9 = vadd.f32 %v595_v4, %v565_v3  ;;  %v525_v10 = vadd.f32 %v524_v2, %v424_v7  ;;  %v566_v11 = vmul.f32 %v424_v7, %v424_v7 }
 0x11e   : > { %v526_v13 = vadd.f32 %v745_v61, %v525_v10  ;;  %v597_v14 = vadd.f32 %v596_v9, %v566_v11  ;;  %v578_v61 = vmul.f32 %v918_v52, %v918_v52  ;;  %v582_v10 = vmul.f32 %v488_v8, %v488_v8 }
 0x120   : > { %v598_v16 = vadd.f32 %v597_v14, %v567_v12  ;;  %v749_v17 = vpop.f32.mrb[12].mxu0  ;;  %v527_v18 = vadd.f32 %v746_v5, %v526_v13  ;;  %v765_v19 = vpop.f32.mrb[12].mxu1 }
 0x121   : > { %v437_v20 = vpop.f32.mrb[13].mxu0  ;;  %v501_v21 = vpop.f32.mrb[13].mxu1  ;;  %v571_v36 = vmul.f32 %v749_v17, %v749_v17 }
 0x122   : > { %v528_v22 = vadd.f32 %v527_v18, %v437_v20  ;;  %v569_v23 = vmul.f32 %v437_v20, %v437_v20  ;;  %v599_v24 = vadd.f32 %v598_v16, %v568_v15  ;;  %v750_v25 = vpop.f32.mrb[14].mxu0  ;;  %v766_v27 = vpop.f32.mrb[14].mxu1  ;;  %v585_v15 = vmul.f32 %v501_v21, %v501_v21 }
 0x123   : > { %v440_v29 = vpop.f32.mrb[15].mxu0  ;;  %v504_v31 = vpop.f32.mrb[15].mxu1  ;;  %v572_v39 = vmul.f32 %v750_v25, %v750_v25  ;;  %v587_v20 = vmul.f32 %v765_v19, %v765_v19 }
 0x124   : > { %v600_v33 = vadd.f32 %v599_v24, %v569_v23  ;;  %v529_v34 = vadd.f32 %v528_v22, %v440_v29  ;;  %v570_v35 = vmul.f32 %v440_v29, %v440_v29  ;;  %v586_v18 = vmul.f32 %v504_v31, %v504_v31 }
 0x125   : > { %v588_v23 = vmul.f32 %v766_v27, %v766_v27 }
 0x126   : > { %v530_v37 = vadd.f32 %v749_v17, %v529_v34  ;;  %v601_v38 = vadd.f32 %v600_v33, %v570_v35 }
 0x128   : > { %v602_v40 = vadd.f32 %v601_v38, %v571_v36  ;;  %v531_v41 = vadd.f32 %v750_v25, %v530_v37 }
 0x12a   : > { %v532_v44 = vadd.f32 %v531_v41, %v906_v28  ;;  %v603_v46 = vadd.f32 %v602_v40, %v572_v39  ;;  %v577_v28 = vmul.f32 %v914_v45, %v914_v45 }
 0x12c   : > { %v604_v47 = vadd.f32 %v603_v46, %v573_v42  ;;  %v533_v48 = vadd.f32 %v532_v44, %v910_v32 }
 0x12e   : > { %v534_v53 = vadd.f32 %v904_v26, %v533_v48  ;;  %v605_v54 = vadd.f32 %v604_v47, %v574_v49  ;;  %v579_v26 = vmul.f32 %v912_v43, %v912_v43 }
 0x130   : > { %v606_v56 = vadd.f32 %v605_v54, %v575_v51  ;;  %v535_v57 = vadd.f32 %v908_v30, %v534_v53  ;;  %v580_v30 = vmul.f32 %v916_v50, %v916_v50 }
 0x132   : > { %v536_v58 = vadd.f32 %v535_v57, %v914_v45  ;;  %v607_v59 = vadd.f32 %v606_v56, %v576_v55  ;;  %v581_v45 = vmul.f32 %v485_v1, %v485_v1 }
 0x134   : > { %v608_v60 = vadd.f32 %v607_v59, %v577_v28  ;;  %v537_v32 = vadd.f32 %v536_v58, %v918_v52  ;;  %v583_v52 = vmul.f32 %v920_v63, %v920_v63 }
 0x136   : > { %v538_v62 = vadd.f32 %v912_v43, %v537_v32  ;;  %v609_v0 = vadd.f32 %v608_v60, %v578_v61  ;;  %v584_v43 = vmul.f32 %v922_v6, %v922_v6 }
 0x138   : > { %v610_v2 = vadd.f32 %v609_v0, %v579_v26  ;;  %v539_v3 = vadd.f32 %v916_v50, %v538_v62 }
 0x13a   : > { %v540_v4 = vadd.f32 %v539_v3, %v485_v1  ;;  %v611_v5 = vadd.f32 %v610_v2, %v580_v30 }
 0x13c   : > { %v612_v7 = vadd.f32 %v611_v5, %v581_v45  ;;  %v541_v9 = vadd.f32 %v540_v4, %v488_v8 }
 0x13e   : > { %v542_v11 = vadd.f32 %v920_v63, %v541_v9  ;;  %v613_v12 = vadd.f32 %v612_v7, %v582_v10 }
 0x140   : > { %v614_v13 = vadd.f32 %v613_v12, %v583_v52  ;;  %v543_v14 = vadd.f32 %v922_v6, %v542_v11 }
 0x142   : > { %v544_v50 = vadd.f32 %v543_v14, %v501_v21  ;;  %v615_v16 = vadd.f32 %v614_v13, %v584_v43 }
 0x144   : > { %v616_v1 = vadd.f32 %v615_v16, %v585_v15  ;;  %v545_v17 = vadd.f32 %v544_v50, %v504_v31  ;;  %v516_v31 = vld [vmem:[%s971_s2] sm:$0x1] }
 0x146   : > { %v546_v8 = vadd.f32 %v765_v19, %v545_v17  ;;  %v617_v22 = vadd.f32 %v616_v1, %v586_v18 }
 0x148   : > { %v547_v24 = vadd.f32 %v766_v27, %v546_v8  ;;  %v618_v25 = vadd.f32 %v617_v22, %v587_v20  ;;  %v556_v27 = vld [vmem:[%s972_s3] sm:$0x1] }
 0x14a   : > { %v548_v63 = vrot.slane %v547_v24, 4  ;;  %v619_v29 = vadd.f32 %v618_v25, %v588_v23 }
 0x14c   : > { %v549_v33 = vadd.f32 %v548_v63, %v547_v24  ;;  %v620_v34 = vrot.slane %v619_v29, 4 }
 0x14e   : > { %v550_v35 = vrot.slane %v549_v33, 2  ;;  %v621_v36 = vadd.f32 %v620_v34, %v619_v29 }
 0x150   : > { %v551_v37 = vadd.f32 %v550_v35, %v549_v33  ;;  %v622_v6 = vrot.slane %v621_v36, 2 }
 0x152   : > { %v552_v38 = vrot.slane %v551_v37, 1  ;;  %v623_v21 = vadd.f32 %v622_v6, %v621_v36 }
 0x154   : > { %v553_v39 = vadd.f32 %v552_v38, %v551_v37  ;;  %v624_v19 = vrot.slane %v623_v21, 1 }
 0x156   : > { %v554_v40 = vadd.f32 %v553_v39, %v516_v31  ;;  %v625_v41 = vadd.f32 %v624_v19, %v623_v21 }
 0x158   : > { %555 = vst [vmem:[%s971_s2] sm:$0x1] %v554_v40  ;;  %v626_v42 = vadd.f32 %v625_v41, %v556_v27 }
 0x15a   : > { %627 = vst [vmem:[%s972_s3] sm:$0x1] %v626_v42 }
 0x15b PF: > { %s14_s12 = sadd.s32 1, %s822_s12  }
 0x15c   : > { %p11_p5 = scmp.ge.s32.totalorder %s14_s12, 4  }
 0x15e   :  { %13 = sbr.rel (!%p11_p5) target bundleno = 1 (0x1), region = 66 }

// kernel: deconv2d_batchnorm.3
= control target key start
LH: loop header
LB: loop body
LE: loop exit
PB: predicated region body
PF: predicated region fallthrough
CT: control target
= control target key end

     0   :  { %s911_s15 = smov 0   ;;  %s1082_s0 = inlined_call_operand.vmem [shape: bf16[512,128], index: 0, kind: input, shape index: {}]   ;;  %s1083_s1 = inlined_call_operand.vmem [shape: bf16[128,128], index: 1, kind: input, shape index: {}]   ;;  %s1084_s2 = inlined_call_operand.vmem [shape: f32[1,128], index: 2, kind: input, shape index: {}]   ;;  %s1085_s3 = inlined_call_operand.vmem [shape: f32[1,128], index: 3, kind: input, shape index: {}]   ;;  %s1086_s4 = inlined_call_operand.vmem [shape: f32[512,128], index: 4, kind: output, shape index: {}]  }
   0x1 LB: > { %s721_s16 = sadd.s32 4294967295, %s884_s15   ;;  %p725_p0 = scmp.ge.s32.totalorder %s884_s15, 1  ;;  %s884_s15 = sphi %s911_s15, %s14_s15  }
   0x2   : > { %p163_p1 = scmp.lt.s32.totalorder %s884_s15, 3 }
   0x4   : > { %p164_p2 = pnand %p725_p0, %p163_p1 }
   0x5   : > { %v854_v0 = vld [vmem:[%s1083_s1] sm:$0xff] (!%p164_p2)   ;;  %s726_s19 = sshll.u32 (!%p164_p2), %s721_s16, 5  ;;  %v855_v1 = vld [vmem:[%s1083_s1 + $0x8] sm:$0xff] (!%p164_p2)   ;;  %v856_v2 = vld [vmem:[%s1083_s1 + $0x10] sm:$0xff] (!%p164_p2)  }
   0x6   : > { %167 = sbr.rel (%p164_p2) target bundleno = 282 (0x11a), region = 36  ;;  %p190_p3 = scmp.lt.s32.totalorder (!%p164_p2), %s726_s19, 63  ;;  %782 = vmatprep.subr.bf16.mxu0 (!%p164_p2), %v854_v0  ;;  %830 = vmatprep.subr.bf16.mxu1 (!%p164_p2), %v854_v0  ;;  %v857_v3 = vld [vmem:[%s1083_s1 + $0x18] sm:$0xff] (!%p164_p2)   ;;  %v858_v6 = vld [vmem:[%s1083_s1 + $0x20] sm:$0xff] (!%p164_p2)   ;;  %v859_v7 = vld [vmem:[%s1083_s1 + $0x28] sm:$0xff] (!%p164_p2)  }
   0x7   : > { %783 = vmatpush3.bf16.msra.mxu0 (!%p164_p2), %v854_v0  ;;  %838 = vmatpush3.bf16.msra.mxu1 (!%p164_p2), %v854_v0  ;;  %v860_v8 = vld [vmem:[%s1083_s1 + $0x30] sm:$0xff] (!%p164_p2)   ;;  %v861_v9 = vld [vmem:[%s1083_s1 + $0x38] sm:$0xff] (!%p164_p2)   ;;  %v970_v24 = vld [vmem:[%s1084_s2] ss:$0 sm:$0xff] (!%p164_p2) }
   0x8   : > { %784 = vmatprep.subr.bf16.mxu0 (!%p164_p2), %v855_v1  ;;  %831 = vmatprep.subr.bf16.mxu1 (!%p164_p2), %v855_v1  ;;  %v976_v26 = vld [vmem:[%s1085_s3] ss:$0 sm:$0xff] (!%p164_p2) }
   0xb   : > { %785 = vmatpush3.bf16.msra.mxu0 (!%p164_p2), %v855_v1  ;;  %839 = vmatpush3.bf16.msra.mxu1 (!%p164_p2), %v855_v1 }
   0xc   : > { %786 = vmatprep.subr.bf16.mxu0 (!%p164_p2), %v856_v2  ;;  %832 = vmatprep.subr.bf16.mxu1 (!%p164_p2), %v856_v2 }
   0xd   : > { %s1088_s19 = smov (!%p190_p3, %s726_s19), 63 }
   0xe   : > { %s727_s24 = sshll.u32 %s1088_s19, 2  ;;  %s729_s14 = sshll.u32 %s1088_s19, 3 }
   0xf   : > { %s934_s27 = scalar_lea.vmem %s1082_s0, %s727_s24  ;;  %787 = vmatpush3.bf16.msra.mxu0 %v856_v2  ;;  %840 = vmatpush3.bf16.msra.mxu1 %v856_v2  ;;  %s983_s21 = scalar_lea.vmem %s1086_s4, %s729_s14 }
  0x10   : > { %v862_v4 = vld [vmem:[%s934_s27] sm:$0xff]   ;;  %788 = vmatprep.subr.bf16.mxu0 %v857_v3  ;;  %833 = vmatprep.subr.bf16.mxu1 %v857_v3  ;;  %v864_v10 = vld [vmem:[%s934_s27 + $0x8] sm:$0xff]   ;;  %v866_v12 = vld [vmem:[%s934_s27 + $0x10] sm:$0xff]  }
  0x11   : > { %v863_v5 = vld [vmem:[%s934_s27 + $0x40] sm:$0xff]   ;;  %798 = vmatprep.mubr.bf16.mxu0 %v862_v4  ;;  %v865_v11 = vld [vmem:[%s934_s27 + $0x48] sm:$0xff]   ;;  %v867_v13 = vld [vmem:[%s934_s27 + $0x50] sm:$0xff]  }
  0x12   : > { %814 = vmatprep.mubr.bf16.mxu1 %v863_v5  ;;  %v868_v14 = vld [vmem:[%s934_s27 + $0x18] sm:$0xff]   ;;  %v870_v16 = vld [vmem:[%s934_s27 + $0x20] sm:$0xff]   ;;  %v872_v18 = vld [vmem:[%s934_s27 + $0x28] sm:$0xff]  }
  0x13   : > { %789 = vmatpush3.bf16.msra.mxu0 %v857_v3  ;;  %841 = vmatpush3.bf16.msra.mxu1 %v857_v3  ;;  %v869_v15 = vld [vmem:[%s934_s27 + $0x58] sm:$0xff]   ;;  %v871_v17 = vld [vmem:[%s934_s27 + $0x60] sm:$0xff]   ;;  %v873_v19 = vld [vmem:[%s934_s27 + $0x68] sm:$0xff]  }
  0x14   : > { %790 = vmatprep.subr.bf16.mxu0 %v858_v6  ;;  %834 = vmatprep.subr.bf16.mxu1 %v858_v6  ;;  %v874_v20 = vld [vmem:[%s934_s27 + $0x30] sm:$0xff]   ;;  %v876_v22 = vld [vmem:[%s934_s27 + $0x38] sm:$0xff]  }
  0x15   : > { %v875_v21 = vld [vmem:[%s934_s27 + $0x70] sm:$0xff]   ;;  %v877_v23 = vld [vmem:[%s934_s27 + $0x78] sm:$0xff]  }
  0x17   : > { %791 = vmatpush3.bf16.msra.mxu0 %v858_v6  ;;  %842 = vmatpush3.bf16.msra.mxu1 %v858_v6 }
  0x18   : > { %792 = vmatprep.subr.bf16.mxu0 %v859_v7  ;;  %835 = vmatprep.subr.bf16.mxu1 %v859_v7 }
  0x1b   : > { %793 = vmatpush3.bf16.msra.mxu0 %v859_v7  ;;  %843 = vmatpush3.bf16.msra.mxu1 %v859_v7 }
  0x1c   : > { %794 = vmatprep.subr.bf16.mxu0 %v860_v8  ;;  %836 = vmatprep.subr.bf16.mxu1 %v860_v8 }
  0x1f   : > { %795 = vmatpush3.bf16.msra.mxu0 %v860_v8  ;;  %844 = vmatpush3.bf16.msra.mxu1 %v860_v8 }
  0x20   : > { %796 = vmatprep.subr.bf16.mxu0 %v861_v9  ;;  %837 = vmatprep.subr.bf16.mxu1 %v861_v9 }
  0x23   : > { %797 = vmatpush3.bf16.msra.mxu0 %v861_v9  ;;  %845 = vmatpush3.bf16.msra.mxu1 %v861_v9 }
  0x26   : > { %799 = vmatmul.mubr.bf16.vlgmr.msra.gmra.mrb[0].mxu0 %v864_v10  ;;  %815 = vmatmul.mubr.bf16.vlgmr.msra.gmra.mrb[0].mxu1 %v865_v11 }
  0x27   : > { %802 = vmatprep.mubr.bf16.mxu0 %v866_v12  ;;  %818 = vmatprep.mubr.bf16.mxu1 %v867_v13 }
  0x2e   : > { %803 = vmatmul.mubr.bf16.gmra.mrb[4].mxu0 %v868_v14  ;;  %819 = vmatmul.mubr.bf16.gmra.mrb[4].mxu1 %v869_v15 }
  0x2f   : > { %806 = vmatprep.mubr.bf16.mxu0 %v870_v16  ;;  %822 = vmatprep.mubr.bf16.mxu1 %v871_v17 }
  0x36   : > { %807 = vmatmul.mubr.bf16.gmra.mrb[8].mxu0 %v872_v18  ;;  %823 = vmatmul.mubr.bf16.gmra.mrb[8].mxu1 %v873_v19 }
  0x37   : > { %810 = vmatprep.mubr.bf16.mxu0 %v874_v20  ;;  %826 = vmatprep.mubr.bf16.mxu1 %v875_v21 }
  0x3e   : > { %811 = vmatmul.mubr.bf16.gmra.mrb[12].mxu0 %v876_v22  ;;  %827 = vmatmul.mubr.bf16.gmra.mrb[12].mxu1 %v877_v23 }
  0xf9   : > { %v800_v25 = vpop.f32.mrb[0].mxu0  ;;  %v816_v27 = vpop.f32.mrb[0].mxu1 }
  0xfa   : > { %v564_v28 = vmul.f32 %v800_v25, %v970_v24  ;;  %v580_v29 = vmul.f32 %v816_v27, %v970_v24  ;;  %v428_v30 = vpop.f32.mrb[1].mxu0  ;;  %v492_v31 = vpop.f32.mrb[1].mxu1 }
  0xfb   : > { %v562_v32 = vmul.f32 %v970_v24, %v428_v30  ;;  %v578_v33 = vmul.f32 %v970_v24, %v492_v31  ;;  %v801_v34 = vpop.f32.mrb[2].mxu0  ;;  %v817_v35 = vpop.f32.mrb[2].mxu1 }
  0xfc   : > { %v603_v36 = vadd.f32 %v976_v26, %v564_v28  ;;  %v619_v37 = vadd.f32 %v976_v26, %v580_v29  ;;  %v565_v38 = vmul.f32 %v801_v34, %v970_v24  ;;  %v581_v39 = vmul.f32 %v817_v35, %v970_v24  ;;  %v431_v40 = vpop.f32.mrb[3].mxu0  ;;  %v495_v41 = vpop.f32.mrb[3].mxu1 }
  0xfd   : > { %v601_v42 = vadd.f32 %v976_v26, %v562_v32  ;;  %v617_v43 = vadd.f32 %v976_v26, %v578_v33  ;;  %v563_v44 = vmul.f32 %v970_v24, %v431_v40  ;;  %v579_v45 = vmul.f32 %v970_v24, %v495_v41 }
  0xfe   : > { %635 = vst [vmem:[%s983_s21 + $0x10] sm:$0xff] %v603_v36  ;;  %651 = vst [vmem:[%s983_s21 + $0x90] sm:$0xff] %v619_v37  ;;  %v604_v46 = vadd.f32 %v976_v26, %v565_v38  ;;  %v620_v47 = vadd.f32 %v976_v26, %v581_v39 }
  0xff   : > { %633 = vst [vmem:[%s983_s21] sm:$0xff] %v601_v42  ;;  %649 = vst [vmem:[%s983_s21 + $0x80] sm:$0xff] %v617_v43  ;;  %v602_v48 = vadd.f32 %v976_v26, %v563_v44  ;;  %v618_v49 = vadd.f32 %v976_v26, %v579_v45 }
 0x100   : > { %636 = vst [vmem:[%s983_s21 + $0x18] sm:$0xff] %v604_v46  ;;  %652 = vst [vmem:[%s983_s21 + $0x98] sm:$0xff] %v620_v47 }
 0x101   : > { %634 = vst [vmem:[%s983_s21 + $0x8] sm:$0xff] %v602_v48  ;;  %650 = vst [vmem:[%s983_s21 + $0x88] sm:$0xff] %v618_v49  ;;  %v804_v50 = vpop.f32.mrb[4].mxu0  ;;  %v820_v51 = vpop.f32.mrb[4].mxu1 }
 0x102   : > { %v568_v52 = vmul.f32 %v804_v50, %v970_v24  ;;  %v584_v53 = vmul.f32 %v820_v51, %v970_v24  ;;  %v444_v54 = vpop.f32.mrb[5].mxu0  ;;  %v508_v55 = vpop.f32.mrb[5].mxu1 }
 0x103   : > { %v566_v56 = vmul.f32 %v970_v24, %v444_v54  ;;  %v582_v57 = vmul.f32 %v970_v24, %v508_v55  ;;  %v805_v58 = vpop.f32.mrb[6].mxu0  ;;  %v821_v59 = vpop.f32.mrb[6].mxu1 }
 0x104   : > { %v607_v60 = vadd.f32 %v976_v26, %v568_v52  ;;  %v623_v61 = vadd.f32 %v976_v26, %v584_v53  ;;  %v569_v62 = vmul.f32 %v805_v58, %v970_v24  ;;  %v585_v63 = vmul.f32 %v821_v59, %v970_v24  ;;  %v447_v0 = vpop.f32.mrb[7].mxu0  ;;  %v511_v1 = vpop.f32.mrb[7].mxu1 }
 0x105   : > { %v605_v2 = vadd.f32 %v976_v26, %v566_v56  ;;  %v621_v3 = vadd.f32 %v976_v26, %v582_v57  ;;  %v567_v4 = vmul.f32 %v970_v24, %v447_v0  ;;  %v583_v5 = vmul.f32 %v970_v24, %v511_v1 }
 0x106   : > { %639 = vst [vmem:[%s983_s21 + $0x30] sm:$0xff] %v607_v60  ;;  %655 = vst [vmem:[%s983_s21 + $0xb0] sm:$0xff] %v623_v61  ;;  %v608_v6 = vadd.f32 %v976_v26, %v569_v62  ;;  %v624_v7 = vadd.f32 %v976_v26, %v585_v63 }
 0x107   : > { %637 = vst [vmem:[%s983_s21 + $0x20] sm:$0xff] %v605_v2  ;;  %653 = vst [vmem:[%s983_s21 + $0xa0] sm:$0xff] %v621_v3  ;;  %v606_v8 = vadd.f32 %v976_v26, %v567_v4  ;;  %v622_v9 = vadd.f32 %v976_v26, %v583_v5 }
 0x108   : > { %640 = vst [vmem:[%s983_s21 + $0x38] sm:$0xff] %v608_v6  ;;  %656 = vst [vmem:[%s983_s21 + $0xb8] sm:$0xff] %v624_v7 }
 0x109   : > { %638 = vst [vmem:[%s983_s21 + $0x28] sm:$0xff] %v606_v8  ;;  %654 = vst [vmem:[%s983_s21 + $0xa8] sm:$0xff] %v622_v9  ;;  %v808_v10 = vpop.f32.mrb[8].mxu0  ;;  %v824_v11 = vpop.f32.mrb[8].mxu1 }
 0x10a   : > { %v572_v12 = vmul.f32 %v808_v10, %v970_v24  ;;  %v588_v13 = vmul.f32 %v824_v11, %v970_v24  ;;  %v460_v14 = vpop.f32.mrb[9].mxu0  ;;  %v524_v15 = vpop.f32.mrb[9].mxu1 }
 0x10b   : > { %v570_v16 = vmul.f32 %v970_v24, %v460_v14  ;;  %v586_v17 = vmul.f32 %v970_v24, %v524_v15  ;;  %v809_v18 = vpop.f32.mrb[10].mxu0  ;;  %v825_v19 = vpop.f32.mrb[10].mxu1 }
 0x10c   : > { %v611_v20 = vadd.f32 %v976_v26, %v572_v12  ;;  %v627_v21 = vadd.f32 %v976_v26, %v588_v13  ;;  %v573_v22 = vmul.f32 %v809_v18, %v970_v24  ;;  %v589_v23 = vmul.f32 %v825_v19, %v970_v24  ;;  %v463_v25 = vpop.f32.mrb[11].mxu0  ;;  %v527_v27 = vpop.f32.mrb[11].mxu1 }
 0x10d   : > { %v609_v28 = vadd.f32 %v976_v26, %v570_v16  ;;  %v625_v29 = vadd.f32 %v976_v26, %v586_v17  ;;  %v571_v30 = vmul.f32 %v970_v24, %v463_v25  ;;  %v587_v31 = vmul.f32 %v970_v24, %v527_v27 }
 0x10e   : > { %643 = vst [vmem:[%s983_s21 + $0x50] sm:$0xff] %v611_v20  ;;  %659 = vst [vmem:[%s983_s21 + $0xd0] sm:$0xff] %v627_v21  ;;  %v612_v32 = vadd.f32 %v976_v26, %v573_v22  ;;  %v628_v33 = vadd.f32 %v976_v26, %v589_v23 }
 0x10f   : > { %641 = vst [vmem:[%s983_s21 + $0x40] sm:$0xff] %v609_v28  ;;  %657 = vst [vmem:[%s983_s21 + $0xc0] sm:$0xff] %v625_v29  ;;  %v610_v34 = vadd.f32 %v976_v26, %v571_v30  ;;  %v626_v35 = vadd.f32 %v976_v26, %v587_v31 }
 0x110   : > { %644 = vst [vmem:[%s983_s21 + $0x58] sm:$0xff] %v612_v32  ;;  %660 = vst [vmem:[%s983_s21 + $0xd8] sm:$0xff] %v628_v33 }
 0x111   : > { %642 = vst [vmem:[%s983_s21 + $0x48] sm:$0xff] %v610_v34  ;;  %658 = vst [vmem:[%s983_s21 + $0xc8] sm:$0xff] %v626_v35  ;;  %v812_v36 = vpop.f32.mrb[12].mxu0  ;;  %v828_v37 = vpop.f32.mrb[12].mxu1 }
 0x112   : > { %v576_v38 = vmul.f32 %v812_v36, %v970_v24  ;;  %v592_v39 = vmul.f32 %v828_v37, %v970_v24  ;;  %v476_v40 = vpop.f32.mrb[13].mxu0  ;;  %v540_v41 = vpop.f32.mrb[13].mxu1 }
 0x113   : > { %v574_v42 = vmul.f32 %v970_v24, %v476_v40  ;;  %v590_v43 = vmul.f32 %v970_v24, %v540_v41  ;;  %v813_v44 = vpop.f32.mrb[14].mxu0  ;;  %v829_v45 = vpop.f32.mrb[14].mxu1 }
 0x114   : > { %v615_v46 = vadd.f32 %v976_v26, %v576_v38  ;;  %v631_v47 = vadd.f32 %v976_v26, %v592_v39  ;;  %v577_v48 = vmul.f32 %v813_v44, %v970_v24  ;;  %v593_v49 = vmul.f32 %v829_v45, %v970_v24  ;;  %v479_v50 = vpop.f32.mrb[15].mxu0  ;;  %v543_v51 = vpop.f32.mrb[15].mxu1 }
 0x115   : > { %v613_v52 = vadd.f32 %v976_v26, %v574_v42  ;;  %v629_v53 = vadd.f32 %v976_v26, %v590_v43  ;;  %v575_v54 = vmul.f32 %v970_v24, %v479_v50  ;;  %v591_v55 = vmul.f32 %v970_v24, %v543_v51 }
 0x116   : > { %647 = vst [vmem:[%s983_s21 + $0x70] sm:$0xff] %v615_v46  ;;  %663 = vst [vmem:[%s983_s21 + $0xf0] sm:$0xff] %v631_v47  ;;  %v616_v56 = vadd.f32 %v976_v26, %v577_v48  ;;  %v632_v57 = vadd.f32 %v976_v26, %v593_v49 }
 0x117   : > { %645 = vst [vmem:[%s983_s21 + $0x60] sm:$0xff] %v613_v52  ;;  %661 = vst [vmem:[%s983_s21 + $0xe0] sm:$0xff] %v629_v53  ;;  %v614_v58 = vadd.f32 %v976_v26, %v575_v54  ;;  %v630_v59 = vadd.f32 %v976_v26, %v591_v55 }
 0x118   : > { %648 = vst [vmem:[%s983_s21 + $0x78] sm:$0xff] %v616_v56  ;;  %664 = vst [vmem:[%s983_s21 + $0xf8] sm:$0xff] %v632_v57 }
 0x119   : > { %646 = vst [vmem:[%s983_s21 + $0x68] sm:$0xff] %v614_v58  ;;  %662 = vst [vmem:[%s983_s21 + $0xe8] sm:$0xff] %v630_v59 }
 0x11a PF: > { %s14_s15 = sadd.s32 1, %s884_s15  }
 0x11b   : > { %p11_p4 = scmp.ge.s32.totalorder %s14_s15, 4  }
 0x11d   :  { %13 = sbr.rel (!%p11_p4) target bundleno = 1 (0x1), region = 66 }

</bundles_post_ra>
